<compile_context>
chip_gen: v5e
topology: v5e:2x2
jax: 0.10.0
libtpu: 0.0.40
codegen_flags: <defaults>
</compile_context>

<pallas_src>
from functools import partial

import jax
import jax.numpy as jnp
from jax.experimental import pallas as pl
from jax.experimental.pallas import tpu as pltpu


def _chan_ln_kernel(x_ref, g_ref, b_ref, o_ref, *, eps, inv_c):
    # x_ref / o_ref: (C, T)      g_ref / b_ref: (C, 1)
    # Pass 1: one-pass channel reduction (sum, sum of squares), f32 accum.
    x32 = x_ref[...].astype(jnp.float32)                 # (C, T)
    s1 = jnp.sum(x32, axis=0, keepdims=True)             # (1, T)
    s2 = jnp.sum(x32 * x32, axis=0, keepdims=True)       # (1, T)
    mean = s1 * inv_c
    var = s2 * inv_c - mean * mean                       # E[x^2] - E[x]^2
    inv = jax.lax.rsqrt(var + eps)                       # (1, T), EUP

    g = g_ref[...].astype(jnp.float32)                   # (C, 1)
    b = b_ref[...].astype(jnp.float32)                   # (C, 1)

    # Pass 2: re-read the ref (no full f32 block copy held live across the
    # reduction; bf16 data stays packed and is upcast per-op).
    xc = x_ref[...].astype(jnp.float32) - mean           # (C, T)
    o_ref[...] = (xc * inv * g + b).astype(o_ref.dtype)


def _round_up(v, m):
    return -(-v // m) * m


def _pick_spatial_tile(hw, c, itemsize, batch, *, target_bytes=2 << 20,
                       min_programs=2):
    """Largest 128-multiple tile with C*tile*itemsize <= target_bytes,
    clamped to the padded spatial extent, then shrunk until the grid has at
    least `min_programs` programs (so both v7x TensorCores get work)."""
    hw_pad = _round_up(hw, 128)
    tile = max(128, (target_bytes // (c * itemsize)) // 128 * 128)
    tile = min(tile, hw_pad)
    while batch * (-(-hw // tile)) < min_programs and tile > 128:
        tile = max(128, _round_up(tile // 2, 128))
    return tile


def chan_layer_norm(x, g, b, eps=1e-5):
    """x: (B, C, H, W); g, b broadcastable to (C,) (e.g. shape (1, C, 1, 1))."""
    B, C, H, W = x.shape
    HW = H * W
    itemsize = jnp.dtype(x.dtype).itemsize

    tile = _pick_spatial_tile(HW, C, itemsize, B)
    n_spatial = -(-HW // tile)                      # cdiv -> ragged tail ok

    x2 = x.reshape(B, C, HW)                        # contiguous merge, free
    g2 = jnp.asarray(g).reshape(C, 1)
    b2 = jnp.asarray(b).reshape(C, 1)

    # Pipeline footprint: 2x in + 2x out blocks + ~2 blocks of f32 temps.
    block_f32_bytes = C * tile * 4
    vmem_limit = int(min(48 << 20, max(32 << 20, 8 * block_f32_bytes)))

    cost = pl.CostEstimate(
        flops=7 * B * C * HW,
        transcendentals=B * HW,
        bytes_accessed=2 * B * C * HW * itemsize + 2 * C * itemsize,
    )

    out = pl.pallas_call(
        partial(_chan_ln_kernel, eps=float(eps), inv_c=1.0 / C),
        out_shape=jax.ShapeDtypeStruct((B, C, HW), x.dtype),
        grid=(B, n_spatial),
        in_specs=[
            pl.BlockSpec((pl.Squeezed(), C, tile), lambda i, j: (i, 0, j)),
            pl.BlockSpec((C, 1), lambda i, j: (0, 0)),
            pl.BlockSpec((C, 1), lambda i, j: (0, 0)),
        ],
        out_specs=pl.BlockSpec((pl.Squeezed(), C, tile), lambda i, j: (i, 0, j)),
        compiler_params=pltpu.CompilerParams(
            dimension_semantics=("parallel", "parallel"),
            vmem_limit_bytes=vmem_limit,
        ),
        cost_estimate=cost,
    )(x2, g2, b2)

    return out.reshape(B, C, H, W)


def chan_layer_norm_ref(x, g, b, eps=1e-5):
    """Pure-JAX reference matching PyTorch ChanLayerNorm semantics (f32 math)."""
    C = x.shape[1]
    xf = x.astype(jnp.float32)
    mean = jnp.mean(xf, axis=1, keepdims=True)
    var = jnp.mean((xf - mean) ** 2, axis=1, keepdims=True)   # unbiased=False
    gg = jnp.asarray(g).astype(jnp.float32).reshape(1, C, 1, 1)
    bb = jnp.asarray(b).astype(jnp.float32).reshape(1, C, 1, 1)
    return (xf - mean) / jnp.sqrt(var + eps) * gg + bb


if __name__ == "__main__":
    key = jax.random.PRNGKey(0)
    kx, kg, kb, kx2 = jax.random.split(key, 4)

    # --- Primary test: small shapes implied by the module spec (f32). ---
    B, C, H, W = 2, 4, 16, 16
    x = jax.random.normal(kx, (B, C, H, W), dtype=jnp.float32)
    g = 1.0 + 0.1 * jax.random.normal(kg, (1, C, 1, 1), dtype=jnp.float32)
    b = 0.1 * jax.random.normal(kb, (1, C, 1, 1), dtype=jnp.float32)

    out = jax.block_until_ready(chan_layer_norm(x, g, b))
    ref = chan_layer_norm_ref(x, g, b)
    assert out.shape == (B, C, H, W)
    assert jnp.allclose(out, ref, atol=1e-5, rtol=1e-5), "f32 mismatch vs reference"

    # --- Ragged-tail / bf16 / B=1 test: SepViT-like 14x14 spatial. ---
    # HW=196 is not a multiple of 128 -> exercises the padded tail block and
    # the >=2-program split that keeps both v7x TensorCores busy at B=1.
    B2, C2, H2, W2 = 1, 32, 14, 14
    x2 = jax.random.normal(kx2, (B2, C2, H2, W2), dtype=jnp.float32).astype(jnp.bfloat16)
    g2 = 1.0 + 0.1 * jax.random.normal(kg, (1, C2, 1, 1), dtype=jnp.float32)
    b2 = 0.1 * jax.random.normal(kb, (1, C2, 1, 1), dtype=jnp.float32)

    out2 = jax.block_until_ready(chan_layer_norm(x2, g2, b2))
    ref2 = chan_layer_norm_ref(x2, g2, b2)
    assert out2.shape == (B2, C2, H2, W2)
    assert out2.dtype == jnp.bfloat16
    assert jnp.allclose(out2.astype(jnp.float32), ref2, atol=3e-2, rtol=3e-2), \
        "bf16 ragged-tail mismatch vs reference"

    print("KERNEL_OK")
</pallas_src>

<mosaic_0001>
module attributes {stable_mosaic.version = 11 : i64} {
  func.func @_chan_ln_kernel(%arg0: i32, %arg1: i32, %arg2: memref<1x4x256xf32, #tpu.memory_space<vmem>>, %arg3: memref<4x1xf32, #tpu.memory_space<vmem>>, %arg4: memref<4x1xf32, #tpu.memory_space<vmem>>, %arg5: memref<1x4x256xf32, #tpu.memory_space<vmem>>) attributes {dimension_semantics = [#tpu.dimension_semantics<parallel>, #tpu.dimension_semantics<parallel>], iteration_bounds = array<i64: 2, 1>, scalar_prefetch = 0 : i64, scratch_operands = 0 : i64, tpu.core_type = #tpu.core_type<tc>, window_params = [{transform_indices = @transform_0, window_bounds = array<i64: 1, 4, 256>}, {pipeline_mode = #tpu.pipeline_mode<synchronous>, transform_indices = @transform_1, window_bounds = array<i64: 4, 1>}, {pipeline_mode = #tpu.pipeline_mode<synchronous>, transform_indices = @transform_2, window_bounds = array<i64: 4, 1>}, {transform_indices = @transform_3, window_bounds = array<i64: 1, 4, 256>}]} {
    %c0 = arith.constant 0 : index
    %c0_0 = arith.constant 0 : index
    %c0_1 = arith.constant 0 : index
    %0 = vector.load %arg2[%c0, %c0_0, %c0_1] : memref<1x4x256xf32, #tpu.memory_space<vmem>>, vector<1x4x256xf32>
    %1 = vector.shape_cast %0 : vector<1x4x256xf32> to vector<4x256xf32>
    %cst = arith.constant dense<0.000000e+00> : vector<256xf32>
    %2 = vector.multi_reduction <add>, %1, %cst [0] : vector<4x256xf32> to vector<256xf32>
    %3 = vector.shape_cast %2 : vector<256xf32> to vector<1x256xf32>
    %4 = arith.mulf %1, %1 : vector<4x256xf32>
    %cst_2 = arith.constant dense<0.000000e+00> : vector<256xf32>
    %5 = vector.multi_reduction <add>, %4, %cst_2 [0] : vector<4x256xf32> to vector<256xf32>
    %6 = vector.shape_cast %5 : vector<256xf32> to vector<1x256xf32>
    %cst_3 = arith.constant 2.500000e-01 : f32
    %7 = vector.broadcast %cst_3 : f32 to vector<1x256xf32>
    %8 = arith.mulf %3, %7 : vector<1x256xf32>
    %cst_4 = arith.constant 2.500000e-01 : f32
    %9 = vector.broadcast %cst_4 : f32 to vector<1x256xf32>
    %10 = arith.mulf %6, %9 : vector<1x256xf32>
    %11 = arith.mulf %8, %8 : vector<1x256xf32>
    %12 = arith.subf %10, %11 : vector<1x256xf32>
    %cst_5 = arith.constant 9.99999974E-6 : f32
    %13 = vector.broadcast %cst_5 : f32 to vector<1x256xf32>
    %14 = arith.addf %12, %13 : vector<1x256xf32>
    %15 = math.rsqrt %14 : vector<1x256xf32>
    %c0_6 = arith.constant 0 : index
    %c0_7 = arith.constant 0 : index
    %16 = vector.load %arg3[%c0_6, %c0_7] : memref<4x1xf32, #tpu.memory_space<vmem>>, vector<4x1xf32>
    %c0_8 = arith.constant 0 : index
    %c0_9 = arith.constant 0 : index
    %17 = vector.load %arg4[%c0_8, %c0_9] : memref<4x1xf32, #tpu.memory_space<vmem>>, vector<4x1xf32>
    %c0_10 = arith.constant 0 : index
    %c0_11 = arith.constant 0 : index
    %c0_12 = arith.constant 0 : index
    %18 = vector.load %arg2[%c0_10, %c0_11, %c0_12] : memref<1x4x256xf32, #tpu.memory_space<vmem>>, vector<1x4x256xf32>
    %19 = vector.shape_cast %18 : vector<1x4x256xf32> to vector<4x256xf32>
    %20 = vector.broadcast %8 : vector<1x256xf32> to vector<4x256xf32>
    %21 = arith.subf %19, %20 : vector<4x256xf32>
    %22 = vector.broadcast %15 : vector<1x256xf32> to vector<4x256xf32>
    %23 = arith.mulf %21, %22 : vector<4x256xf32>
    %24 = vector.broadcast %16 : vector<4x1xf32> to vector<4x256xf32>
    %25 = arith.mulf %23, %24 : vector<4x256xf32>
    %26 = vector.broadcast %17 : vector<4x1xf32> to vector<4x256xf32>
    %27 = arith.addf %25, %26 : vector<4x256xf32>
    %c0_13 = arith.constant 0 : index
    %c0_14 = arith.constant 0 : index
    %c0_15 = arith.constant 0 : index
    %28 = vector.load %arg5[%c0_13, %c0_14, %c0_15] : memref<1x4x256xf32, #tpu.memory_space<vmem>>, vector<1x4x256xf32>
    %29 = vector.shape_cast %28 : vector<1x4x256xf32> to vector<4x256xf32>
    %30 = vector.shape_cast %27 : vector<4x256xf32> to vector<1x4x256xf32>
    tpu.vector_store %arg5[%c0_13, %c0_14, %c0_15], %30 {strides = array<i32>} : memref<1x4x256xf32, #tpu.memory_space<vmem>>, vector<1x4x256xf32>,
    return
  }
  func.func @transform_0(%arg0: i32, %arg1: i32) -> (i32, i32, i32) {
    %c0_i32 = arith.constant 0 : i32
    %c0_i32_0 = arith.constant 0 : i32
    return %arg0, %c0_i32, %arg1 : i32, i32, i32
  }
  func.func @transform_1(%arg0: i32, %arg1: i32) -> (i32, i32) {
    %c0_i32 = arith.constant 0 : i32
    %c0_i32_0 = arith.constant 0 : i32
    %c0_i32_1 = arith.constant 0 : i32
    return %c0_i32, %c0_i32_0 : i32, i32
  }
  func.func @transform_2(%arg0: i32, %arg1: i32) -> (i32, i32) {
    %c0_i32 = arith.constant 0 : i32
    %c0_i32_0 = arith.constant 0 : i32
    %c0_i32_1 = arith.constant 0 : i32
    return %c0_i32, %c0_i32_0 : i32, i32
  }
  func.func @transform_3(%arg0: i32, %arg1: i32) -> (i32, i32, i32) {
    %c0_i32 = arith.constant 0 : i32
    %c0_i32_0 = arith.constant 0 : i32
    return %arg0, %c0_i32, %arg1 : i32, i32, i32
  }
}

</mosaic_0001>

<bundles_post_ra>
// kernel: tpu_custom_call.1
= control target key start
LH: loop header
LB: loop body
LE: loop exit
PB: predicated region body
PF: predicated region fallthrough
CT: control target
= control target key end

     0   :  { %8 = vsyncpa [#allocation3], 0  ;;  %s784_s0 = inlined_call_operand.hbm [shape: f32[2,4,256], index: 0, kind: input, shape index: {}]   ;;  %s785_s1 = inlined_call_operand.vmem [shape: f32[4,1], index: 1, kind: input, shape index: {}]   ;;  %s786_s2 = inlined_call_operand.vmem [shape: f32[4,1], index: 2, kind: input, shape index: {}]   ;;  %s787_s3 = inlined_call_operand.hbm [shape: f32[2,4,256], index: 3, kind: output, shape index: {}]  }
   0x1   :  { %10 = vsyncpa [#allocation3 + $0x1], 0 }
   0x2   :  { %11 = vsyncpa [#allocation4], 0 }
   0x3   :  { %13 = vsyncpa [#allocation4 + $0x1], 0  ;;  %s642_s12 = smov 0   ;;  %s644_s13 = smov 0  }
   0x4   :  { %s646_s14 = smov 0   ;;  %s648_s15 = smov 0  }
   0x5   :  { %s650_s16 = smov 0   ;;  %s652_s17 = smov 0  }
   0x6 LB: > { %s420_s18 = sadd.s32 4294967295, %s618_s17   ;;  %s421_s19 = sadd.s32 4294967294, %s618_s17   ;;  %s618_s17 = sphi %s652_s17, %s19_s17   ;;  %s614_s16 = sphi %s650_s16, %s796_s16   ;;  %s610_s15 = sphi %s648_s15, %s795_s15   ;;  %s606_s14 = sphi %s646_s14, %s794_s14   ;;  %s602_s13 = sphi %s644_s13, %s793_s13   ;;  %s598_s12 = sphi %s642_s12, %s792_s12  }
   0x7   : > { %s31_s20 = sadd.s32 1, %s614_s16  ;;  %s40_s21 = sadd.s32 1, %s606_s14 }
   0x8   : > { %p33_p0 = scmp.ge.s32.totalorder %s31_s20, 2  ;;  %p47_p1 = scmp.ne.s32.totalorder %s606_s14, %s602_s13 }
   0x9   : > { %p48_p2 = scmp.eq.s32.totalorder %s618_s17, 0  ;;  %p53_p3 = scmp.ne.s32.totalorder %s602_s13, %s598_s12 }
   0xa   : > { %s798_s20 = smov (%p33_p0, %s31_s20), 0  ;;  %p54_p5 = scmp.eq.s32.totalorder %s420_s18, 0 }
   0xb   : > { %p683_p4 = por %p48_p2, %p47_p1  ;;  %s35_s23 = ssub.s32 %s614_s16, %s798_s20 }
   0xc   : > { %p121_p6 = scmp.eq.s32.totalorder %s420_s18, 1  ;;  %p38_p7 = scmp.eq.s32.totalorder %s35_s23, 0 }
   0xd   : > { %p689_p8 = por %p54_p5, %p53_p3  ;;  %p127_p10 = scmp.eq.s32.totalorder %s421_s19, 1 }
   0xe   : > { %p693_p9 = por %p121_p6, %p47_p1  ;;  %p423_p12 = scmp.ge.s32.totalorder %s618_s17, 2 }
   0xf   : > { %s698_s26 = scalar_select %p38_p7, %s606_s14, %s40_s21  }
  0x10   : > { %p700_p11 = por %p127_p10, %p53_p3  ;;  %p449_p13 = scmp.lt.s32.totalorder %s618_s17, 2 }
  0x11   : > { %s153_s28 = sand.u32 1, %s606_s14   ;;  %s435_s30 = sshll.u32 %s614_s16, 3 }
  0x12   : > { %s424_s29 = sshll.u32 %s153_s28, 3  ;;  %s164_s6 = scalar_lea.hbm %s784_s0, %s435_s30 }
  0x13   : > { %s157_s7 = scalar_lea.vmem [#allocation2], %s424_s29  ;;  %s166_s9 = sshll.u32 %s164_s6, 4  ;;  %s167_s9 = int_to_ptr.hbm [resolvable:$true] %s166_s9 }
  0x14   : > { %s168_s8 = sshll.u32 %s157_s7, 4  ;;  %p442_p0 = pnand %p449_p13, %p683_p4  ;;  %s169_s8 = int_to_ptr.vmem [resolvable:$true] %s168_s8 }
  0x15   : > { %p427_p1 = scmp.ge.s32.totalorder %s618_s17, 1  ;;  %p173_p2 = scmp.lt.s32.totalorder %s618_s17, 3 }
  0x16   : > { %s154_s10 = scalar_lea.sflag [#allocation3], %s153_s28 }
  0x17   : > { %444 = dma.hbm_to_vmem [thread:$0]  (!%p442_p0), %s167_s9, 128, %s169_s8, %s154_s10  }
  0x18   : > { %p174_p3 = pnand %p427_p1, %p173_p2 }
  0x19   : > { %s716_s11 = sand.u32 (!%p174_p3), 1, %s602_s13  }
  0x1a   : > { %177 = sbr.rel (%p174_p3) target bundleno = 164 (0xa4), region = 32  ;;  %s428_s18 = sshll.u32 (!%p174_p3), %s716_s11, 3 }
  0x1b   : > { %s180_s19 = scalar_lea.sflag (!%p174_p3), [#allocation3], %s716_s11  ;;  %s183_s21 = scalar_lea.vmem (!%p174_p3), [#allocation2], %s428_s18 }
  0x1f   : > { %589 = dma.done.wait (%p689_p8), %s180_s19, 128  }
  0x20   : > { %591 = vsyncadd (%p689_p8), %s180_s19, 4294967168  ;;  %v620_v0 = vmov 0   ;;  %v282_v1 = vld [vmem:[%s785_s1] sm:$0xf]  ;;  %v732_v3 = vld [vmem:[%s183_s21] sm:$0xff]  ;;  %vm216_vm0 = vcmask 1043456  }
  0x21   : > { %501 = vset.pattern.permute.xlu0 %v620_v0  ;;  %v283_v2 = vld [vmem:[%s786_s2] sm:$0xf]  ;;  %211 = vst [vmem:[#allocation1] ss:$2 sm:$0xff] %v732_v3  ;;  %v231_v4 = vmul.f32 %v732_v3, %v732_v3  ;;  %v621_v61 = vmov 839922192  }
  0x22   : > { %298 = vperm.xlu0 %501, %v282_v1   ;;  %v301_v62 = vunpack.c.l.s4 %v621_v61  ;;  %s436_s24 = sshll.u32 %s610_s15, 3  ;;  %s206_s6 = scalar_lea.vmem [#allocation5], %s428_s18 }
  0x23   : > { %s331_s5 = scalar_lea.hbm %s787_s3, %s436_s24  ;;  %s333_s7 = sshll.u32 %s206_s6, 4  ;;  %s334_s7 = int_to_ptr.vmem [resolvable:$true] %s333_s7 }
  0x24   : > { %s335_s8 = sshll.u32 %s331_s5, 4  ;;  %s318_s9 = scalar_lea.sflag [#allocation4], %s716_s11  ;;  %s336_s8 = int_to_ptr.hbm [resolvable:$true] %s335_s8 }
  0x25   : > { %s550_s15 = sshra.s32 %s336_s8, 4  ;;  %s556_s18 = scalar_lea.hbm %s787_s3, 16  ;;  %s551_s15 = int_to_ptr.hbm [resolvable:$true] %s550_s15 }
  0x26   : > { %s552_s10 = scalar_lea.hbm %s551_s15, 8  ;;  %p557_p7 = scmp.lt.s32.totalorder %s551_s15, %s787_s3 }
  0x27   : > { %p553_p4 = scmp.ne.s32.totalorder %s551_s15, %s552_s10  ;;  %p558_p8 = scmp.lt.s32.totalorder %s556_s18, %s552_s10 }
  0x28   : > { %v212_v5 = vld.sshfl [vmem:[#allocation1] sm:$0xff pattern:$0x75316420]  ;;  %v213_v6 = vld.sshfl [vmem:[#allocation1 + $0x8] sm:$0xff pattern:$0x75316420] }
  0x29   : > { %233 = vst [vmem:[#allocation1] ss:$2 sm:$0xff] %v231_v4  ;;  %v224_v7 = vsel %vm216_vm0, %v213_v6, 0.0  ;;  %v217_v10 = vsel %vm216_vm0, %v212_v5, 0.0  ;;  %v302_v4 = vunpack.c.0.s8 %v301_v62  ;;  %p554_p5 = pnand %p553_p4, %p693_p9  ;;  %p559_p10 = por %p558_p8, %p557_p7 }
  0x2a   : > { %308 = vperm.xlu0 %501, %v283_v2   ;;  %v225_v8 = vrot.slane %v224_v7, 4  ;;  %v218_v12 = vrot.slane %v217_v10, 4 }
  0x2b   : > { %p555_p6 = pneg %p554_p5 }
  0x2c   : > { %v226_v13 = vadd.f32 %v225_v8, %v224_v7  ;;  %v219_v17 = vadd.f32 %v218_v12, %v217_v10 }
  0x2d   : > { %p560_p13 = pnand %p559_p10, %p555_p6 }
  0x2e   : > { %v227_v18 = vrot.slane %v226_v13, 2  ;;  %v220_v21 = vrot.slane %v219_v17, 2 }
  0x30   : > { %v235_v9 = vld.sshfl [vmem:[#allocation1 + $0x8] sm:$0xff pattern:$0x75316420]  ;;  %v234_v14 = vld.sshfl [vmem:[#allocation1] sm:$0xff pattern:$0x75316420]  ;;  %v228_v22 = vadd.f32 %v227_v18, %v226_v13  ;;  %v221_v25 = vadd.f32 %v220_v21, %v219_v17 }
  0x31   : > { %v245_v11 = vsel %vm216_vm0, %v235_v9, 0.0  ;;  %v238_v16 = vsel %vm216_vm0, %v234_v14, 0.0 }
  0x32   : > { %v246_v15 = vrot.slane %v245_v11, 4  ;;  %v239_v19 = vrot.slane %v238_v16, 4  ;;  %v229_v26 = vrot.slane %v228_v22, 1  ;;  %v222_v29 = vrot.slane %v221_v25, 1 }
  0x34   : > { %v247_v20 = vadd.f32 %v246_v15, %v245_v11  ;;  %v240_v23 = vadd.f32 %v239_v19, %v238_v16  ;;  %v230_v30 = vadd.f32 %v229_v26, %v228_v22  ;;  %v223_v33 = vadd.f32 %v222_v29, %v221_v25 }
  0x36   : > { %v248_v24 = vrot.slane %v247_v20, 2  ;;  %v241_v27 = vrot.slane %v240_v23, 2  ;;  %v253_v36 = vmul.f32 0.25, %v230_v30  ;;  %v252_v38 = vmul.f32 0.25, %v223_v33 }
  0x38   : > { %v249_v28 = vadd.f32 %v248_v24, %v247_v20  ;;  %v242_v31 = vadd.f32 %v241_v27, %v240_v23  ;;  %v257_v40 = vmul.f32 %v253_v36, %v253_v36  ;;  %v256_v42 = vmul.f32 %v252_v38, %v252_v38 }
  0x39   : > { %v286_v58 = vrot.slane %v253_v36, 4 }
  0x3a   : > { %v250_v32 = vrot.slane %v249_v28, 1  ;;  %v243_v34 = vrot.slane %v242_v31, 1 }
  0x3b   : > { %v287_v63 = vsel %vm216_vm0, %v252_v38, %v286_v58 }
  0x3c   : > { %v251_v35 = vadd.f32 %v250_v32, %v249_v28  ;;  %v244_v37 = vadd.f32 %v243_v34, %v242_v31  ;;  %v289_v5 = vsub.f32 %v732_v3, %v287_v63 }
  0x3e   : > { %v255_v39 = vmul.f32 0.25, %v251_v35  ;;  %v254_v41 = vmul.f32 0.25, %v244_v37 }
  0x40   : > { %v259_v43 = vsub.f32 %v255_v39, %v257_v40  ;;  %v258_v44 = vsub.f32 %v254_v41, %v256_v42 }
  0x42   : > { %v261_v45 = vadd.f32 1e-05, %v259_v43  ;;  %v260_v46 = vadd.f32 1e-05, %v258_v44 }
  0x44   : > { %502 = vrsqrt.f32 %v261_v45  ;;  %vm278_vm1 = vweird.f32 %v261_v45  ;;  %vm268_vm4 = vweird.f32 %v260_v46 }
  0x45   : > { %504 = vrsqrt.f32 %v260_v46 }
  0x4a   : > { %v503_v47 = vpop.eup %502 }
  0x4b   : > { %v273_v48 = vmul.f32 %v503_v47, %v261_v45  ;;  %v505_v49 = vpop.eup %504  ;;  %vm279_vm2 = vweird.f32 %v503_v47 }
  0x4c   : > { %v263_v50 = vmul.f32 %v505_v49, %v260_v46  ;;  %vm280_vm3 = vmor %vm278_vm1, %vm279_vm2  ;;  %vm269_vm5 = vweird.f32 %v505_v49 }
  0x4d   : > { %v274_v51 = vmul.f32 %v503_v47, %v273_v48  ;;  %vm270_vm6 = vmor %vm268_vm4, %vm269_vm5 }
  0x4e   : > { %v264_v52 = vmul.f32 %v505_v49, %v263_v50 }
  0x4f   : > { %v275_v53 = vmul.f32 0.5, %v274_v51 }
  0x50   : > { %v265_v54 = vmul.f32 0.5, %v264_v52 }
  0x51   : > { %v276_v55 = vsub.f32 1.5, %v275_v53 }
  0x52   : > { %v266_v56 = vsub.f32 1.5, %v265_v54 }
  0x53   : > { %v277_v57 = vmul.f32 %v503_v47, %v276_v55 }
  0x54   : > { %v267_v59 = vmul.f32 %v505_v49, %v266_v56 }
  0x55   : > { %v281_v60 = vsel %vm280_vm3, %v503_v47, %v277_v57 }
  0x56   : > { %v292_v0 = vrot.slane %v281_v60, 4  ;;  %v271_v1 = vsel %vm270_vm6, %v505_v49, %v267_v59 }
  0x58   : > { %v293_v6 = vsel %vm216_vm0, %v271_v1, %v292_v0 }
  0x59   : > { %v295_v7 = vmul.f32 %v293_v6, %v289_v5 }
  0x94   : > { %v299_v2 = vpop.permute.xlu0 %298 }
  0x95   : > { %v303_v8 = vperm.slane %v299_v2, %v302_v4 }
  0x97   : > { %v305_v10 = vmul.f32 %v303_v8, %v295_v7 }
  0x9c   : > { %v309_v9 = vpop.permute.xlu0 %308 }
  0x9d   : > { %v313_v11 = vperm.slane %v309_v9, %v302_v4 }
  0x9f   : > { %v315_v12 = vadd.f32 %v313_v11, %v305_v10 }
  0xa1   : > { %316 = vst [vmem:[%s206_s6] sm:$0xff] %v315_v12 }
  0xa2   : > { %563 = shalt.err (!%p560_p13)
}
  0xa3   : > { %439 = dma.vmem_to_hbm [thread:$0]  (%p693_p9), %s334_s7, 128, %s336_s8, %s318_s9  }
  0xa4 PF: > { %s347_s11 = sand.u32 1, %s598_s12   ;;  %p446_p0 = pnand %p423_p12, %p700_p11 }
  0xa5   : > { %s348_s28 = scalar_lea.sflag [#allocation4], %s347_s11 }
  0xa6   : > { %p447_p1 = pneg %p446_p0 }
  0xa8   : > { %593 = dma.done.wait (%p447_p1), %s348_s28, 128  }
  0xa9   : > { %595 = vsyncadd (%p447_p1), %s348_s28, 4294967168  ;;  %s19_s17 = sadd.s32 1, %s618_s17   ;;  %s792_s12 = smov %s602_s13 }
  0xaa   : > { %p16_p2 = scmp.ge.s32.totalorder %s19_s17, 4   ;;  %s793_s13 = smov %s606_s14 }
  0xab   : > { %s794_s14 = smov %s698_s26  ;;  %s795_s15 = smov %s614_s16 }
  0xac   : > { %s796_s16 = smov %s798_s20  ;;  %18 = sbr.rel (!%p16_p2) target bundleno = 6 (0x6), region = 77 }
  0xb1   :  { %354 = vsyncpa [#allocation3], 1 }
  0xb2   :  { %356 = vsyncpa [#allocation3 + $0x1], 1 }
  0xb3   :  { %357 = vsyncpa [#allocation4], 1 }
  0xb4   :  { %359 = vsyncpa [#allocation4 + $0x1], 1 }

</bundles_post_ra>
